<compile_context>
chip_gen: v5e
topology: v5e:2x2
jax: 0.10.0
libtpu: 0.0.40
codegen_flags: <defaults>
</compile_context>

<pallas_src>
import math
import numpy as np
import jax
import jax.numpy as jnp
from jax import lax
from jax.experimental import pallas as pl
from jax.experimental.pallas import tpu as pltpu


def _round_up(x, m):
    return ((x + m - 1) // m) * m


# -----------------------------------------------------------------------------
# Kernel: T decode steps in one pallas_call (grid axis over steps, "arbitrary").
# -----------------------------------------------------------------------------
def make_decoder_kernel(num_layers, batch_pad, vocab_pad, hidden_size):
    inv_sqrt_h = 1.0 / math.sqrt(hidden_size)

    def kernel(x_ref, h0_ref, enc_ref, *rest):
        layer_refs = rest[:3 * num_layers]            # per layer: w_in, w_hhT, b
        (fc_wd_ref, fc_wc_ref, fc_b_ref,
         pred_ref, hout_ref, h_scr) = rest[3 * num_layers:]

        t = pl.program_id(0)

        # Load the initial hidden state into the VMEM carry once (step 0).
        @pl.when(t == 0)
        def _init():
            h_scr[...] = h0_ref[...]

        # Lane-dense one-hot; embedding is folded into layer 0's input weights.
        ids = x_ref[0]                                               # (B_pad, 1) int32
        iota = lax.broadcasted_iota(jnp.int32, (batch_pad, vocab_pad), 1)
        inp = (iota == ids).astype(jnp.float32)                      # (B_pad, V_pad)

        # Stacked tanh-RNN step: two accumulating dots per layer (no lane concat).
        for l in range(num_layers):
            w_in = layer_refs[3 * l][...]             # (V_pad, H) for l=0, else (H, H)
            w_hh = layer_refs[3 * l + 1][...]         # (H, H)
            b = layer_refs[3 * l + 2][...]            # (1, H)  (b_ih + b_hh)
            h_prev = h_scr[l]                         # (B_pad, H)
            h_new = jnp.tanh(
                jnp.dot(inp, w_in, preferred_element_type=jnp.float32)
                + jnp.dot(h_prev, w_hh, preferred_element_type=jnp.float32)
                + b)
            h_scr[l] = h_new
            inp = h_new
        decoded = inp                                 # (B_pad, H)

        # Scaled dot-product attention over batch-major encoder outputs.
        # Softmax normalization is folded into the (B, H) context.
        enc = enc_ref[...]                                                 # (B_pad, S, H)
        scores = jnp.sum(enc * decoded[:, None, :], axis=-1) * inv_sqrt_h  # (B_pad, S)
        m = jnp.max(scores, axis=-1, keepdims=True)
        e = jnp.exp(scores - m)                                            # (B_pad, S)
        denom = jnp.sum(e, axis=-1, keepdims=True)                         # (B_pad, 1)
        ctx_un = jnp.sum(e[:, :, None] * enc, axis=1)                      # (B_pad, H)
        context = ctx_un * pl.reciprocal(denom, approx=False)              # (B_pad, H)

        # Final linear: two accumulating matmuls onto a lane-dense (B_pad, V_pad) tile.
        pred_ref[0] = (
            jnp.dot(decoded, fc_wd_ref[...], preferred_element_type=jnp.float32)
            + jnp.dot(context, fc_wc_ref[...], preferred_element_type=jnp.float32)
            + fc_b_ref[...])

        # Write the carried hidden state back exactly once (last step).
        @pl.when(t == pl.num_programs(0) - 1)
        def _finalize():
            hout_ref[...] = h_scr[...]

    return kernel


# -----------------------------------------------------------------------------
# One-time parameter preparation (hoisted out of the decode loop entirely).
# -----------------------------------------------------------------------------
def prepare_decoder_params(params):
    emb = params["embedding"]                          # (vocab, embd)
    vocab, _ = emb.shape
    num_layers = len(params["w_ih"])
    hidden_size = params["w_hh"][0].shape[0]
    vocab_pad = _round_up(vocab, 128)

    layers = []
    # Layer 0: fold the embedding into the input projection (one-hot @ emb_proj).
    emb_proj = jnp.dot(emb, params["w_ih"][0].T,
                       precision=lax.Precision.HIGHEST)               # (vocab, H)
    emb_proj = jnp.pad(emb_proj, ((0, vocab_pad - vocab), (0, 0)))    # (V_pad, H)
    layers.append((emb_proj,
                   params["w_hh"][0].T,
                   (params["b_ih"][0] + params["b_hh"][0]).reshape(1, hidden_size)))
    for l in range(1, num_layers):
        layers.append((params["w_ih"][l].T,
                       params["w_hh"][l].T,
                       (params["b_ih"][l] + params["b_hh"][l]).reshape(1, hidden_size)))

    fc_w = params["fc_w"]                              # (vocab, 2H)
    pad = vocab_pad - vocab
    fc_w_dec = jnp.pad(fc_w[:, :hidden_size].T, ((0, 0), (0, pad)))   # (H, V_pad)
    fc_w_ctx = jnp.pad(fc_w[:, hidden_size:].T, ((0, 0), (0, pad)))   # (H, V_pad)
    fc_b = jnp.pad(params["fc_b"], (0, pad)).reshape(1, vocab_pad)    # (1, V_pad)

    return {
        "num_layers": num_layers, "hidden_size": hidden_size,
        "vocab": vocab, "vocab_pad": vocab_pad,
        "layers": layers,
        "fc_w_dec": fc_w_dec, "fc_w_ctx": fc_w_ctx, "fc_b": fc_b,
    }


# -----------------------------------------------------------------------------
# Multi-step wrapper: T teacher-forced decode steps in ONE pallas_call.
# -----------------------------------------------------------------------------
def decoder_decode(x_seq, hidden, encoder_outputs, prepped):
    """x_seq: (T, batch) int32; hidden: (L, batch, H); encoder_outputs: (S, batch, H).
    Returns (preds (T, batch, vocab), new_hidden (L, batch, H))."""
    T, batch = x_seq.shape
    num_layers, _, hidden_size = hidden.shape
    seq_len = encoder_outputs.shape[0]
    vocab = prepped["vocab"]
    vocab_pad = prepped["vocab_pad"]
    batch_pad = _round_up(batch, 8)
    pad_b = batch_pad - batch

    # Step-invariant padding / batch-major permute, done once per call.
    x_p = jnp.pad(x_seq.astype(jnp.int32), ((0, 0), (0, pad_b)))[..., None]  # (T,B_pad,1)
    h_p = jnp.pad(hidden, ((0, 0), (0, pad_b), (0, 0)))                       # (L,B_pad,H)
    enc_bm = jnp.pad(jnp.transpose(encoder_outputs, (1, 0, 2)),
                     ((0, pad_b), (0, 0), (0, 0)))                            # (B_pad,S,H)

    inputs = [x_p, h_p, enc_bm]
    in_specs = [
        pl.BlockSpec((1, batch_pad, 1), lambda t: (t, 0, 0)),                 # ids per step
        pl.BlockSpec((num_layers, batch_pad, hidden_size), lambda t: (0, 0, 0)),
        pl.BlockSpec((batch_pad, seq_len, hidden_size), lambda t: (0, 0, 0)),
    ]
    # Weights: constant index_maps -> resident in VMEM for the whole decode.
    for (w_in, w_hh, b) in prepped["layers"]:
        inputs += [w_in, w_hh, b]
        in_specs += [pl.BlockSpec(w_in.shape, lambda t: (0, 0)),
                     pl.BlockSpec(w_hh.shape, lambda t: (0, 0)),
                     pl.BlockSpec(b.shape, lambda t: (0, 0))]
    inputs += [prepped["fc_w_dec"], prepped["fc_w_ctx"], prepped["fc_b"]]
    in_specs += [pl.BlockSpec(prepped["fc_w_dec"].shape, lambda t: (0, 0)),
                 pl.BlockSpec(prepped["fc_w_ctx"].shape, lambda t: (0, 0)),
                 pl.BlockSpec(prepped["fc_b"].shape, lambda t: (0, 0))]

    out_specs = (
        pl.BlockSpec((1, batch_pad, vocab_pad), lambda t: (t, 0, 0)),         # per-step pred
        pl.BlockSpec((num_layers, batch_pad, hidden_size), lambda t: (0, 0, 0)),
    )

    kernel = make_decoder_kernel(num_layers, batch_pad, vocab_pad, hidden_size)

    preds_pad, hout_pad = pl.pallas_call(
        kernel,
        grid=(T,),
        in_specs=in_specs,
        out_specs=out_specs,
        out_shape=(
            jax.ShapeDtypeStruct((T, batch_pad, vocab_pad), jnp.float32),
            jax.ShapeDtypeStruct((num_layers, batch_pad, hidden_size), jnp.float32),
        ),
        scratch_shapes=[pltpu.VMEM((num_layers, batch_pad, hidden_size), jnp.float32)],
        compiler_params=pltpu.CompilerParams(dimension_semantics=("arbitrary",)),
    )(*inputs)

    # Padded vocab logits are exactly 0 — slice before exposing (argmax safety).
    return preds_pad[:, :batch, :vocab], hout_pad[:, :batch, :]


# -----------------------------------------------------------------------------
# Single-step wrapper (exact semantics of the PyTorch Decoder.forward).
# -----------------------------------------------------------------------------
def decoder_forward(x, hidden, encoder_outputs, prepped):
    preds, new_hidden = decoder_decode(x[None, :], hidden, encoder_outputs, prepped)
    return preds[0], new_hidden


# -----------------------------------------------------------------------------
# Pure-JAX reference (mirrors the PyTorch forward semantics).
# -----------------------------------------------------------------------------
def decoder_forward_ref(x, hidden, encoder_outputs, params):
    hp = lax.Precision.HIGHEST
    emb = params["embedding"][x]                                   # (batch, embd)
    inp = emb
    new_h = []
    num_layers = hidden.shape[0]
    for l in range(num_layers):
        h = jnp.tanh(jnp.dot(inp, params["w_ih"][l].T, precision=hp)
                     + params["b_ih"][l]
                     + jnp.dot(hidden[l], params["w_hh"][l].T, precision=hp)
                     + params["b_hh"][l])
        new_h.append(h)
        inp = h
    decoded = inp                                                  # (batch, hidden)
    enc_p = jnp.transpose(encoder_outputs, (1, 0, 2))              # (batch, seq, hidden)
    scores = jnp.einsum("blh,bh->bl", enc_p, decoded,
                        precision=hp) / np.sqrt(hidden.shape[-1])
    alpha = jax.nn.softmax(scores, axis=1)
    context = jnp.einsum("bl,blh->bh", alpha, enc_p, precision=hp)
    out = jnp.concatenate([decoded, context], axis=-1)
    pred = jnp.dot(out, params["fc_w"].T, precision=hp) + params["fc_b"]
    return pred, jnp.stack(new_h)


# -----------------------------------------------------------------------------
# Main
# -----------------------------------------------------------------------------
if __name__ == "__main__":
    input_size = 16      # vocab
    embd_size = 16
    hidden_size = 32
    num_layers = 2
    batch = 4
    seq_len = 8
    decode_steps = 4

    key = jax.random.PRNGKey(0)
    keys = jax.random.split(key, 8 + 4 * num_layers)
    ki = iter(keys)

    k_rnn = 1.0 / math.sqrt(hidden_size)
    params = {
        "embedding": jax.random.normal(next(ki), (input_size, embd_size), jnp.float32),
        "w_ih": [], "w_hh": [], "b_ih": [], "b_hh": [],
    }
    for l in range(num_layers):
        in_dim = embd_size if l == 0 else hidden_size
        params["w_ih"].append(jax.random.uniform(next(ki), (hidden_size, in_dim),
                                                 jnp.float32, -k_rnn, k_rnn))
        params["w_hh"].append(jax.random.uniform(next(ki), (hidden_size, hidden_size),
                                                 jnp.float32, -k_rnn, k_rnn))
        params["b_ih"].append(jax.random.uniform(next(ki), (hidden_size,),
                                                 jnp.float32, -k_rnn, k_rnn))
        params["b_hh"].append(jax.random.uniform(next(ki), (hidden_size,),
                                                 jnp.float32, -k_rnn, k_rnn))
    k_fc = 1.0 / math.sqrt(2 * hidden_size)
    params["fc_w"] = jax.random.uniform(next(ki), (input_size, 2 * hidden_size),
                                        jnp.float32, -k_fc, k_fc)
    params["fc_b"] = jax.random.uniform(next(ki), (input_size,),
                                        jnp.float32, -k_fc, k_fc)

    x_seq = jax.random.randint(next(ki), (decode_steps, batch), 0, input_size, jnp.int32)
    hidden = jax.random.normal(next(ki), (num_layers, batch, hidden_size), jnp.float32)
    encoder_outputs = jax.random.normal(next(ki), (seq_len, batch, hidden_size),
                                        jnp.float32)

    # One-time weight prep (fusion / transposes / padding) — not per decode step.
    prepped = prepare_decoder_params(params)

    # --- Single-step (exact module forward semantics) ---------------------------
    pred, new_hidden = decoder_forward(x_seq[0], hidden, encoder_outputs, prepped)
    jax.block_until_ready((pred, new_hidden))
    pred_ref, hid_ref = decoder_forward_ref(x_seq[0], hidden, encoder_outputs, params)
    np.testing.assert_allclose(np.asarray(pred), np.asarray(pred_ref),
                               rtol=1e-5, atol=1e-5)
    np.testing.assert_allclose(np.asarray(new_hidden), np.asarray(hid_ref),
                               rtol=1e-5, atol=1e-5)

    # --- Multi-step fused decode (T steps in one pallas_call) -------------------
    preds, final_hidden = decoder_decode(x_seq, hidden, encoder_outputs, prepped)
    jax.block_until_ready((preds, final_hidden))

    h_ref = hidden
    ref_preds = []
    for t in range(decode_steps):
        p_ref, h_ref = decoder_forward_ref(x_seq[t], h_ref, encoder_outputs, params)
        ref_preds.append(p_ref)
    np.testing.assert_allclose(np.asarray(preds), np.asarray(jnp.stack(ref_preds)),
                               rtol=1e-5, atol=1e-5)
    np.testing.assert_allclose(np.asarray(final_hidden), np.asarray(h_ref),
                               rtol=1e-5, atol=1e-5)

    print("KERNEL_OK")
</pallas_src>

<mosaic_0001>
module attributes {stable_mosaic.version = 11 : i64} {
  func.func @kernel(%arg0: i32, %arg1: memref<1x8x1xi32, #tpu.memory_space<vmem>>, %arg2: memref<2x8x32xf32, #tpu.memory_space<vmem>>, %arg3: memref<8x8x32xf32, #tpu.memory_space<vmem>>, %arg4: memref<128x32xf32, #tpu.memory_space<vmem>>, %arg5: memref<32x32xf32, #tpu.memory_space<vmem>>, %arg6: memref<1x32xf32, #tpu.memory_space<vmem>>, %arg7: memref<32x32xf32, #tpu.memory_space<vmem>>, %arg8: memref<32x32xf32, #tpu.memory_space<vmem>>, %arg9: memref<1x32xf32, #tpu.memory_space<vmem>>, %arg10: memref<32x128xf32, #tpu.memory_space<vmem>>, %arg11: memref<32x128xf32, #tpu.memory_space<vmem>>, %arg12: memref<1x128xf32, #tpu.memory_space<vmem>>, %arg13: memref<1x8x128xf32, #tpu.memory_space<vmem>>, %arg14: memref<2x8x32xf32, #tpu.memory_space<vmem>>, %arg15: memref<2x8x32xf32, #tpu.memory_space<vmem>>) attributes {dimension_semantics = [#tpu.dimension_semantics<arbitrary>], iteration_bounds = array<i64: 1>, scalar_prefetch = 0 : i64, scratch_operands = 1 : i64, tpu.core_type = #tpu.core_type<tc>, window_params = [{transform_indices = @transform_0, window_bounds = array<i64: 1, 8, 1>}, {pipeline_mode = #tpu.pipeline_mode<synchronous>, transform_indices = @transform_1, window_bounds = array<i64: 2, 8, 32>}, {pipeline_mode = #tpu.pipeline_mode<synchronous>, transform_indices = @transform_2, window_bounds = array<i64: 8, 8, 32>}, {pipeline_mode = #tpu.pipeline_mode<synchronous>, transform_indices = @transform_3, window_bounds = array<i64: 128, 32>}, {pipeline_mode = #tpu.pipeline_mode<synchronous>, transform_indices = @transform_4, window_bounds = array<i64: 32, 32>}, {pipeline_mode = #tpu.pipeline_mode<synchronous>, transform_indices = @transform_5, window_bounds = array<i64: 1, 32>}, {pipeline_mode = #tpu.pipeline_mode<synchronous>, transform_indices = @transform_6, window_bounds = array<i64: 32, 32>}, {pipeline_mode = #tpu.pipeline_mode<synchronous>, transform_indices = @transform_7, window_bounds = array<i64: 32, 32>}, {pipeline_mode = #tpu.pipeline_mode<synchronous>, transform_indices = @transform_8, window_bounds = array<i64: 1, 32>}, {pipeline_mode = #tpu.pipeline_mode<synchronous>, transform_indices = @transform_9, window_bounds = array<i64: 32, 128>}, {pipeline_mode = #tpu.pipeline_mode<synchronous>, transform_indices = @transform_10, window_bounds = array<i64: 32, 128>}, {pipeline_mode = #tpu.pipeline_mode<synchronous>, transform_indices = @transform_11, window_bounds = array<i64: 1, 128>}, {transform_indices = @transform_12, window_bounds = array<i64: 1, 8, 128>}, {pipeline_mode = #tpu.pipeline_mode<synchronous>, transform_indices = @transform_13, window_bounds = array<i64: 2, 8, 32>}]} {
    %c0_i32 = arith.constant 0 : i32
    %0 = arith.cmpi eq, %arg0, %c0_i32 : i32
    %1 = arith.extui %0 : i1 to i32
    %c0_i32_0 = arith.constant 0 : i32
    %2 = arith.cmpi ne, %1, %c0_i32_0 : i32
    scf.if %2 {
      %c0_50 = arith.constant 0 : index
      %c0_51 = arith.constant 0 : index
      %c0_52 = arith.constant 0 : index
      %73 = vector.load %arg2[%c0_50, %c0_51, %c0_52] : memref<2x8x32xf32, #tpu.memory_space<vmem>>, vector<2x8x32xf32>
      %c0_53 = arith.constant 0 : index
      %c0_54 = arith.constant 0 : index
      %c0_55 = arith.constant 0 : index
      %74 = vector.load %arg15[%c0_53, %c0_54, %c0_55] : memref<2x8x32xf32, #tpu.memory_space<vmem>>, vector<2x8x32xf32>
      tpu.vector_store %arg15[%c0_53, %c0_54, %c0_55], %73 {strides = array<i32>} : memref<2x8x32xf32, #tpu.memory_space<vmem>>, vector<2x8x32xf32>,
    } else {
    }
    %c0 = arith.constant 0 : index
    %c0_1 = arith.constant 0 : index
    %c0_2 = arith.constant 0 : index
    %3 = vector.load %arg1[%c0, %c0_1, %c0_2] : memref<1x8x1xi32, #tpu.memory_space<vmem>>, vector<1x8x1xi32>
    %4 = vector.shape_cast %3 : vector<1x8x1xi32> to vector<8x1xi32>
    %5 = tpu.iota {dimensions = array<i32: 1>} : vector<8x128xi32>
    %6 = vector.broadcast %4 : vector<8x1xi32> to vector<8x128xi32>
    %7 = arith.cmpi eq, %5, %6 : vector<8x128xi32>
    %8 = arith.extui %7 : vector<8x128xi1> to vector<8x128xi32>
    %9 = arith.sitofp %8 : vector<8x128xi32> to vector<8x128xf32>
    %c0_3 = arith.constant 0 : index
    %c0_4 = arith.constant 0 : index
    %10 = vector.load %arg4[%c0_3, %c0_4] : memref<128x32xf32, #tpu.memory_space<vmem>>, vector<128x32xf32>
    %c0_5 = arith.constant 0 : index
    %c0_6 = arith.constant 0 : index
    %11 = vector.load %arg5[%c0_5, %c0_6] : memref<32x32xf32, #tpu.memory_space<vmem>>, vector<32x32xf32>
    %c0_7 = arith.constant 0 : index
    %c0_8 = arith.constant 0 : index
    %12 = vector.load %arg6[%c0_7, %c0_8] : memref<1x32xf32, #tpu.memory_space<vmem>>, vector<1x32xf32>
    %c0_9 = arith.constant 0 : index
    %c0_10 = arith.constant 0 : index
    %c0_11 = arith.constant 0 : index
    %13 = vector.load %arg15[%c0_9, %c0_10, %c0_11] : memref<2x8x32xf32, #tpu.memory_space<vmem>>, vector<1x8x32xf32>
    %14 = vector.shape_cast %13 : vector<1x8x32xf32> to vector<8x32xf32>
    %cst = arith.constant dense<0.000000e+00> : vector<8x32xf32>
    %15 = tpu.matmul %9, %10, %cst {dimension_numbers = #tpu.dot_dimension_numbers<[1], [0], [0], [1], [0, 0, 1, 1], [], []>} : vector<8x128xf32>, vector<128x32xf32>, vector<8x32xf32> -> vector<8x32xf32>
    %cst_12 = arith.constant dense<0.000000e+00> : vector<8x32xf32>
    %16 = tpu.matmul %14, %11, %cst_12 {dimension_numbers = #tpu.dot_dimension_numbers<[1], [0], [0], [1], [0, 0, 1, 1], [], []>} : vector<8x32xf32>, vector<32x32xf32>, vector<8x32xf32> -> vector<8x32xf32>
    %17 = arith.addf %15, %16 : vector<8x32xf32>
    %18 = vector.broadcast %12 : vector<1x32xf32> to vector<8x32xf32>
    %19 = arith.addf %17, %18 : vector<8x32xf32>
    %20 = math.tanh %19 : vector<8x32xf32>
    %c0_13 = arith.constant 0 : index
    %c0_14 = arith.constant 0 : index
    %c0_15 = arith.constant 0 : index
    %21 = vector.load %arg15[%c0_13, %c0_14, %c0_15] : memref<2x8x32xf32, #tpu.memory_space<vmem>>, vector<1x8x32xf32>
    %22 = vector.shape_cast %21 : vector<1x8x32xf32> to vector<8x32xf32>
    %23 = vector.shape_cast %20 : vector<8x32xf32> to vector<1x8x32xf32>
    tpu.vector_store %arg15[%c0_13, %c0_14, %c0_15], %23 {strides = array<i32>} : memref<2x8x32xf32, #tpu.memory_space<vmem>>, vector<1x8x32xf32>,
    %c0_16 = arith.constant 0 : index
    %c0_17 = arith.constant 0 : index
    %24 = vector.load %arg7[%c0_16, %c0_17] : memref<32x32xf32, #tpu.memory_space<vmem>>, vector<32x32xf32>
    %c0_18 = arith.constant 0 : index
    %c0_19 = arith.constant 0 : index
    %25 = vector.load %arg8[%c0_18, %c0_19] : memref<32x32xf32, #tpu.memory_space<vmem>>, vector<32x32xf32>
    %c0_20 = arith.constant 0 : index
    %c0_21 = arith.constant 0 : index
    %26 = vector.load %arg9[%c0_20, %c0_21] : memref<1x32xf32, #tpu.memory_space<vmem>>, vector<1x32xf32>
    %c1 = arith.constant 1 : index
    %c0_22 = arith.constant 0 : index
    %c0_23 = arith.constant 0 : index
    %27 = vector.load %arg15[%c1, %c0_22, %c0_23] : memref<2x8x32xf32, #tpu.memory_space<vmem>>, vector<1x8x32xf32>
    %28 = vector.shape_cast %27 : vector<1x8x32xf32> to vector<8x32xf32>
    %cst_24 = arith.constant dense<0.000000e+00> : vector<8x32xf32>
    %29 = tpu.matmul %20, %24, %cst_24 {dimension_numbers = #tpu.dot_dimension_numbers<[1], [0], [0], [1], [0, 0, 1, 1], [], []>} : vector<8x32xf32>, vector<32x32xf32>, vector<8x32xf32> -> vector<8x32xf32>
    %cst_25 = arith.constant dense<0.000000e+00> : vector<8x32xf32>
    %30 = tpu.matmul %28, %25, %cst_25 {dimension_numbers = #tpu.dot_dimension_numbers<[1], [0], [0], [1], [0, 0, 1, 1], [], []>} : vector<8x32xf32>, vector<32x32xf32>, vector<8x32xf32> -> vector<8x32xf32>
    %31 = arith.addf %29, %30 : vector<8x32xf32>
    %32 = vector.broadcast %26 : vector<1x32xf32> to vector<8x32xf32>
    %33 = arith.addf %31, %32 : vector<8x32xf32>
    %34 = math.tanh %33 : vector<8x32xf32>
    %c1_26 = arith.constant 1 : index
    %c0_27 = arith.constant 0 : index
    %c0_28 = arith.constant 0 : index
    %35 = vector.load %arg15[%c1_26, %c0_27, %c0_28] : memref<2x8x32xf32, #tpu.memory_space<vmem>>, vector<1x8x32xf32>
    %36 = vector.shape_cast %35 : vector<1x8x32xf32> to vector<8x32xf32>
    %37 = vector.shape_cast %34 : vector<8x32xf32> to vector<1x8x32xf32>
    tpu.vector_store %arg15[%c1_26, %c0_27, %c0_28], %37 {strides = array<i32>} : memref<2x8x32xf32, #tpu.memory_space<vmem>>, vector<1x8x32xf32>,
    %c0_29 = arith.constant 0 : index
    %c0_30 = arith.constant 0 : index
    %c0_31 = arith.constant 0 : index
    %38 = vector.load %arg3[%c0_29, %c0_30, %c0_31] : memref<8x8x32xf32, #tpu.memory_space<vmem>>, vector<8x8x32xf32>
    %39 = vector.shape_cast %34 : vector<8x32xf32> to vector<8x1x32xf32>
    %40 = vector.broadcast %39 : vector<8x1x32xf32> to vector<8x8x32xf32>
    %41 = arith.mulf %38, %40 : vector<8x8x32xf32>
    %cst_32 = arith.constant dense<0.000000e+00> : vector<8x8xf32>
    %42 = vector.multi_reduction <add>, %41, %cst_32 [2] : vector<8x8x32xf32> to vector<8x8xf32>
    %cst_33 = arith.constant 0.176776692 : f32
    %43 = vector.broadcast %cst_33 : f32 to vector<8x8xf32>
    %44 = arith.mulf %42, %43 : vector<8x8xf32>
    %cst_34 = arith.constant dense<0xFF800000> : vector<8xf32>
    %45 = vector.multi_reduction <maximumf>, %44, %cst_34 [1] : vector<8x8xf32> to vector<8xf32>
    %46 = vector.shape_cast %45 : vector<8xf32> to vector<8x1xf32>
    %47 = vector.broadcast %46 : vector<8x1xf32> to vector<8x8xf32>
    %48 = arith.subf %44, %47 : vector<8x8xf32>
    %49 = math.exp %48 : vector<8x8xf32>
    %cst_35 = arith.constant dense<0.000000e+00> : vector<8xf32>
    %50 = vector.multi_reduction <add>, %49, %cst_35 [1] : vector<8x8xf32> to vector<8xf32>
    %51 = vector.shape_cast %50 : vector<8xf32> to vector<8x1xf32>
    %52 = vector.shape_cast %49 : vector<8x8xf32> to vector<8x8x1xf32>
    %53 = vector.broadcast %52 : vector<8x8x1xf32> to vector<8x8x32xf32>
    %54 = arith.mulf %53, %38 : vector<8x8x32xf32>
    %cst_36 = arith.constant dense<0.000000e+00> : vector<8x32xf32>
    %55 = vector.multi_reduction <add>, %54, %cst_36 [1] : vector<8x8x32xf32> to vector<8x32xf32>
    %56 = tpu.reciprocal %51 : vector<8x1xf32> -> vector<8x1xf32>
    %57 = vector.broadcast %56 : vector<8x1xf32> to vector<8x32xf32>
    %58 = arith.mulf %55, %57 : vector<8x32xf32>
    %c0_37 = arith.constant 0 : index
    %c0_38 = arith.constant 0 : index
    %59 = vector.load %arg10[%c0_37, %c0_38] : memref<32x128xf32, #tpu.memory_space<vmem>>, vector<32x128xf32>
    %cst_39 = arith.constant dense<0.000000e+00> : vector<8x128xf32>
    %60 = tpu.matmul %34, %59, %cst_39 {dimension_numbers = #tpu.dot_dimension_numbers<[1], [0], [0], [1], [0, 0, 1, 1], [], []>} : vector<8x32xf32>, vector<32x128xf32>, vector<8x128xf32> -> vector<8x128xf32>
    %c0_40 = arith.constant 0 : index
    %c0_41 = arith.constant 0 : index
    %61 = vector.load %arg11[%c0_40, %c0_41] : memref<32x128xf32, #tpu.memory_space<vmem>>, vector<32x128xf32>
    %cst_42 = arith.constant dense<0.000000e+00> : vector<8x128xf32>
    %62 = tpu.matmul %58, %61, %cst_42 {dimension_numbers = #tpu.dot_dimension_numbers<[1], [0], [0], [1], [0, 0, 1, 1], [], []>} : vector<8x32xf32>, vector<32x128xf32>, vector<8x128xf32> -> vector<8x128xf32>
    %63 = arith.addf %60, %62 : vector<8x128xf32>
    %c0_43 = arith.constant 0 : index
    %c0_44 = arith.constant 0 : index
    %64 = vector.load %arg12[%c0_43, %c0_44] : memref<1x128xf32, #tpu.memory_space<vmem>>, vector<1x128xf32>
    %65 = vector.broadcast %64 : vector<1x128xf32> to vector<8x128xf32>
    %66 = arith.addf %63, %65 : vector<8x128xf32>
    %c0_45 = arith.constant 0 : index
    %c0_46 = arith.constant 0 : index
    %c0_47 = arith.constant 0 : index
    %67 = vector.load %arg13[%c0_45, %c0_46, %c0_47] : memref<1x8x128xf32, #tpu.memory_space<vmem>>, vector<1x8x128xf32>
    %68 = vector.shape_cast %67 : vector<1x8x128xf32> to vector<8x128xf32>
    %69 = vector.shape_cast %66 : vector<8x128xf32> to vector<1x8x128xf32>
    tpu.vector_store %arg13[%c0_45, %c0_46, %c0_47], %69 {strides = array<i32>} : memref<1x8x128xf32, #tpu.memory_space<vmem>>, vector<1x8x128xf32>,
    %c0_i32_48 = arith.constant 0 : i32
    %70 = arith.cmpi eq, %arg0, %c0_i32_48 : i32
    %71 = arith.extui %70 : i1 to i32
    %c0_i32_49 = arith.constant 0 : i32
    %72 = arith.cmpi ne, %71, %c0_i32_49 : i32
    scf.if %72 {
      %c0_50 = arith.constant 0 : index
      %c0_51 = arith.constant 0 : index
      %c0_52 = arith.constant 0 : index
      %73 = vector.load %arg15[%c0_50, %c0_51, %c0_52] : memref<2x8x32xf32, #tpu.memory_space<vmem>>, vector<2x8x32xf32>
      %c0_53 = arith.constant 0 : index
      %c0_54 = arith.constant 0 : index
      %c0_55 = arith.constant 0 : index
      %74 = vector.load %arg14[%c0_53, %c0_54, %c0_55] : memref<2x8x32xf32, #tpu.memory_space<vmem>>, vector<2x8x32xf32>
      tpu.vector_store %arg14[%c0_53, %c0_54, %c0_55], %73 {strides = array<i32>} : memref<2x8x32xf32, #tpu.memory_space<vmem>>, vector<2x8x32xf32>,
    } else {
    }
    return
  }
  func.func @transform_0(%arg0: i32) -> (i32, i32, i32) {
    %c0_i32 = arith.constant 0 : i32
    %c0_i32_0 = arith.constant 0 : i32
    %c0_i32_1 = arith.constant 0 : i32
    return %arg0, %c0_i32, %c0_i32_0 : i32, i32, i32
  }
  func.func @transform_1(%arg0: i32) -> (i32, i32, i32) {
    %c0_i32 = arith.constant 0 : i32
    %c0_i32_0 = arith.constant 0 : i32
    %c0_i32_1 = arith.constant 0 : i32
    %c0_i32_2 = arith.constant 0 : i32
    return %c0_i32, %c0_i32_0, %c0_i32_1 : i32, i32, i32
  }
  func.func @transform_2(%arg0: i32) -> (i32, i32, i32) {
    %c0_i32 = arith.constant 0 : i32
    %c0_i32_0 = arith.constant 0 : i32
    %c0_i32_1 = arith.constant 0 : i32
    %c0_i32_2 = arith.constant 0 : i32
    return %c0_i32, %c0_i32_0, %c0_i32_1 : i32, i32, i32
  }
  func.func @transform_3(%arg0: i32) -> (i32, i32) {
    %c0_i32 = arith.constant 0 : i32
    %c0_i32_0 = arith.constant 0 : i32
    %c0_i32_1 = arith.constant 0 : i32
    return %c0_i32, %c0_i32_0 : i32, i32
  }
  func.func @transform_4(%arg0: i32) -> (i32, i32) {
    %c0_i32 = arith.constant 0 : i32
    %c0_i32_0 = arith.constant 0 : i32
    %c0_i32_1 = arith.constant 0 : i32
    return %c0_i32, %c0_i32_0 : i32, i32
  }
  func.func @transform_5(%arg0: i32) -> (i32, i32) {
    %c0_i32 = arith.constant 0 : i32
    %c0_i32_0 = arith.constant 0 : i32
    %c0_i32_1 = arith.constant 0 : i32
    return %c0_i32, %c0_i32_0 : i32, i32
  }
  func.func @transform_6(%arg0: i32) -> (i32, i32) {
    %c0_i32 = arith.constant 0 : i32
    %c0_i32_0 = arith.constant 0 : i32
    %c0_i32_1 = arith.constant 0 : i32
    return %c0_i32, %c0_i32_0 : i32, i32
  }
  func.func @transform_7(%arg0: i32) -> (i32, i32) {
    %c0_i32 = arith.constant 0 : i32
    %c0_i32_0 = arith.constant 0 : i32
    %c0_i32_1 = arith.constant 0 : i32
    return %c0_i32, %c0_i32_0 : i32, i32
  }
  func.func @transform_8(%arg0: i32) -> (i32, i32) {
    %c0_i32 = arith.constant 0 : i32
    %c0_i32_0 = arith.constant 0 : i32
    %c0_i32_1 = arith.constant 0 : i32
    return %c0_i32, %c0_i32_0 : i32, i32
  }
  func.func @transform_9(%arg0: i32) -> (i32, i32) {
    %c0_i32 = arith.constant 0 : i32
    %c0_i32_0 = arith.constant 0 : i32
    %c0_i32_1 = arith.constant 0 : i32
    return %c0_i32, %c0_i32_0 : i32, i32
  }
  func.func @transform_10(%arg0: i32) -> (i32, i32) {
    %c0_i32 = arith.constant 0 : i32
    %c0_i32_0 = arith.constant 0 : i32
    %c0_i32_1 = arith.constant 0 : i32
    return %c0_i32, %c0_i32_0 : i32, i32
  }
  func.func @transform_11(%arg0: i32) -> (i32, i32) {
    %c0_i32 = arith.constant 0 : i32
    %c0_i32_0 = arith.constant 0 : i32
    %c0_i32_1 = arith.constant 0 : i32
    return %c0_i32, %c0_i32_0 : i32, i32
  }
  func.func @transform_12(%arg0: i32) -> (i32, i32, i32) {
    %c0_i32 = arith.constant 0 : i32
    %c0_i32_0 = arith.constant 0 : i32
    %c0_i32_1 = arith.constant 0 : i32
    return %arg0, %c0_i32, %c0_i32_0 : i32, i32, i32
  }
  func.func @transform_13(%arg0: i32) -> (i32, i32, i32) {
    %c0_i32 = arith.constant 0 : i32
    %c0_i32_0 = arith.constant 0 : i32
    %c0_i32_1 = arith.constant 0 : i32
    %c0_i32_2 = arith.constant 0 : i32
    return %c0_i32, %c0_i32_0, %c0_i32_1 : i32, i32, i32
  }
}

</mosaic_0001>

<bundles_post_ra>
// kernel: tpu_custom_call.1
= control target key start
LH: loop header
LB: loop body
LE: loop exit
PB: predicated region body
PF: predicated region fallthrough
CT: control target
= control target key end

     0   :  { %19 = vsyncpa [#allocation4], 0  ;;  %s1176_s0 = inlined_call_operand.vmem [shape: s32[1,8,1], index: 0, kind: input, shape index: {}]   ;;  %s1177_s1 = inlined_call_operand.hbm [shape: f32[2,8,32], index: 1, kind: input, shape index: {}]   ;;  %s1178_s2 = inlined_call_operand.vmem [shape: f32[8,8,32], index: 2, kind: input, shape index: {}]   ;;  %s1179_s3 = inlined_call_operand.vmem [shape: f32[128,32], index: 3, kind: input, shape index: {}]   ;;  %s1180_s4 = inlined_call_operand.vmem [shape: f32[32,32], index: 4, kind: input, shape index: {}]   ;;  %s1181_s5 = inlined_call_operand.vmem [shape: f32[1,32], index: 5, kind: input, shape index: {}]   ;;  %s1182_s6 = inlined_call_operand.vmem [shape: f32[32,32], index: 6, kind: input, shape index: {}]   ;;  %s1183_s7 = inlined_call_operand.vmem [shape: f32[32,32], index: 7, kind: input, shape index: {}]   ;;  %s1184_s8 = inlined_call_operand.vmem [shape: f32[1,32], index: 8, kind: input, shape index: {}]   ;;  %s1185_s9 = inlined_call_operand.hbm [shape: f32[32,128], index: 9, kind: input, shape index: {}]   ;;  %s1186_s10 = inlined_call_operand.hbm [shape: f32[32,128], index: 10, kind: input, shape index: {}]   ;;  %s1187_s11 = inlined_call_operand.vmem [shape: f32[1,128], index: 11, kind: input, shape index: {}]   ;;  %s1188_s12 = inlined_call_operand.hbm [shape: f32[1,8,128], index: 12, kind: output, shape index: {0}]   ;;  %s1189_s13 = inlined_call_operand.hbm [shape: f32[2,8,32], index: 13, kind: output, shape index: {1}]  }
   0x1   :  { %20 = vsyncpa [#allocation7], 0 }
   0x2   :  { %21 = vsyncpa [#allocation5], 0 }
   0x3   :  { %22 = vsyncpa [#allocation11], 0  ;;  %s56_s27 = sshll.u32 %s1185_s9, 4  ;;  %s849_s28 = smov [#allocation6]   ;;  %s57_s27 = int_to_ptr.hbm [resolvable:$true] %s56_s27 }
   0x4   :  { %s58_s29 = sshll.u32 %s849_s28, 4  ;;  %s29_s15 = sshll.u32 %s1177_s1, 4  ;;  %s59_s29 = int_to_ptr.vmem [resolvable:$true] %s58_s29  ;;  %s30_s15 = int_to_ptr.hbm [resolvable:$true] %s29_s15 }
   0x5   :  { %s850_s16 = smov 128   ;;  %s851_s17 = smov 8  }
   0x6   :  { %64 = dma.hbm_to_vmem [thread:$0]  %s57_s27, 512, %s59_s29, [#allocation7], %s850_s16, %s850_s16, %s851_s17  }
   0x7   :  { %s852_s18 = smov [#allocation3]   ;;  %s69_s9 = sshll.u32 %s1186_s10, 4  ;;  %s70_s9 = int_to_ptr.hbm [resolvable:$true] %s69_s9 }
   0x8   :  { %s31_s19 = sshll.u32 %s852_s18, 4  ;;  %s853_s1 = smov [#allocation8]   ;;  %s32_s19 = int_to_ptr.vmem [resolvable:$true] %s31_s19 }
   0x9   :  { %37 = dma.hbm_to_vmem [thread:$0]  %s30_s15, 256, %s32_s19, [#allocation4], %s850_s16, %s850_s16, %s851_s17  }
   0xa   :  { %s71_s22 = sshll.u32 %s853_s1, 4  ;;  %s72_s22 = int_to_ptr.vmem [resolvable:$true] %s71_s22 }
   0xb   :  { %77 = dma.hbm_to_vmem [thread:$0]  %s70_s9, 512, %s72_s22, [#allocation7], %s850_s16, %s850_s16, %s851_s17  }
   0xc   :  { %841 = dma.done.wait [#allocation4], 256  }
   0xd   :  { %842 = vsyncadd [#allocation4], 4294967040 }
   0xe   :  { %843 = dma.done.wait [#allocation7], 1024  }
   0xf   :  { %844 = vsyncadd [#allocation7], 4294966272  ;;  %v854_v0 = vmov 0   ;;  %v101_v1 = vld [vmem:[%s1176_s0] sm:$0xff]  ;;  %v125_v2 = vld [vmem:[%s1179_s3 + $0x78] sm:$0xff]  ;;  %vm98_vm0 = vcmask 261120   ;;  %v102_v24 = vlaneseq }
  0x10   :  { %693 = vset.pattern.permute.xlu0 %v854_v0  ;;  %695 = vset.pattern.permute.xlu2 %v854_v0  ;;  %v124_v3 = vld [vmem:[%s1179_s3 + $0x70] sm:$0xff]  ;;  %v123_v4 = vld [vmem:[%s1179_s3 + $0x68] sm:$0xff]  ;;  %v122_v5 = vld [vmem:[%s1179_s3 + $0x60] sm:$0xff]  ;;  %v855_v27 = vmov 1.0   ;;  %vm333_vm2 = vcmask 1041409   ;;  %vm335_vm3 = vcmask 1042434  }
  0x11   :  { %694 = vset.pattern.permute.xlu1 %v854_v0  ;;  %105 = vperm.xlu0 %693, %v101_v1   ;;  %v129_v6 = vld [vmem:[%s1180_s4 + $0x18] sm:$0xff]  ;;  %v128_v8 = vld [vmem:[%s1180_s4 + $0x10] sm:$0xff]  ;;  %v127_v9 = vld [vmem:[%s1180_s4 + $0x8] sm:$0xff]  ;;  %v1011_v25 = vand.u32 127, %v102_v24  ;;  %vm337_vm4 = vcmask 1043459   ;;  %vm339_vm5 = vcmask 1044484  }
  0x12   :  { %156 = vmatpush.msra.mxu1 %v125_v2  ;;  %v121_v7 = vld [vmem:[%s1179_s3 + $0x58] sm:$0xff]  ;;  %148 = vmatpush.msra.mxu0 %v129_v6  ;;  %v120_v10 = vld [vmem:[%s1179_s3 + $0x50] sm:$0xff]  ;;  %v119_v11 = vld [vmem:[%s1179_s3 + $0x48] sm:$0xff]  ;;  %vm341_vm6 = vcmask 1045509   ;;  %vm343_vm7 = vcmask 1046534   ;;  %vm345_vm8 = vcmask 1047559  }
  0x13   :  { %v118_v12 = vld [vmem:[%s1179_s3 + $0x40] sm:$0xff]  ;;  %v117_v13 = vld [vmem:[%s1179_s3 + $0x38] sm:$0xff]  ;;  %v116_v14 = vld [vmem:[%s1179_s3 + $0x30] sm:$0xff]  ;;  %vm348_vm9 = vcmask 64512   ;;  %s658_s9 = sshll.u32 %s1189_s13, 4  ;;  %s857_s10 = smov [#allocation9]   ;;  %s659_s9 = int_to_ptr.hbm [resolvable:$true] %s658_s9 }
  0x14   :  { %157 = vmatpush.msra.mxu1 %v124_v3  ;;  %149 = vmatpush.msra.mxu0 %v128_v8  ;;  %v115_v15 = vld [vmem:[%s1179_s3 + $0x28] sm:$0xff]  ;;  %v114_v16 = vld [vmem:[%s1179_s3 + $0x20] sm:$0xff]  ;;  %v113_v17 = vld [vmem:[%s1179_s3 + $0x18] sm:$0xff]  ;;  %s648_s23 = sshll.u32 %s1188_s12, 4  ;;  %s649_s23 = int_to_ptr.hbm [resolvable:$true] %s648_s23 }
  0x15   :  { %v112_v18 = vld [vmem:[%s1179_s3 + $0x10] sm:$0xff]  ;;  %v111_v19 = vld [vmem:[%s1179_s3 + $0x8] sm:$0xff]  ;;  %v126_v21 = vld [vmem:[%s1180_s4] sm:$0xff] }
  0x16   :  { %158 = vmatpush.msra.mxu1 %v123_v4  ;;  %150 = vmatpush.msra.mxu0 %v127_v9  ;;  %v96_v20 = vld [vmem:[#allocation3] sm:$0xff]  ;;  %v110_v22 = vld [vmem:[%s1179_s3] sm:$0xff]  ;;  %v97_v28 = vld [vmem:[#allocation3 + $0x8] sm:$0xff] }
  0x17   :  { %99 = vst.msk [vmem:[#allocation2] sm:$0xff] %vm98_vm0, %v96_v20  ;;  %v189_v29 = vld [vmem:[%s1183_s7 + $0x18] sm:$0xff]  ;;  %v188_v31 = vld [vmem:[%s1183_s7 + $0x10] sm:$0xff]  ;;  %v187_v33 = vld [vmem:[%s1183_s7 + $0x8] sm:$0xff] }
  0x18   :  { %159 = vmatpush.msra.mxu1 %v122_v5  ;;  %151 = vmatpush.msra.mxu0 %v126_v21  ;;  %v185_v30 = vld [vmem:[%s1182_s6 + $0x18] sm:$0xff]  ;;  %100 = vst.msk [vmem:[#allocation2 + $0x8] sm:$0xff] %vm98_vm0, %v97_v28  ;;  %v184_v32 = vld [vmem:[%s1182_s6 + $0x10] sm:$0xff]  ;;  %v183_v34 = vld [vmem:[%s1182_s6 + $0x8] sm:$0xff] }
  0x19   :  { %208 = vmatpush.msra.mxu2 %v189_v29  ;;  %231 = vmatpush.msra.mxu3 %v185_v30  ;;  %v186_v35 = vld [vmem:[%s1183_s7] sm:$0xff]  ;;  %v557_v45 = vld [vmem:[#allocation6 + $0x18] sm:$0xff]  ;;  %v556_v46 = vld [vmem:[#allocation6 + $0x10] sm:$0xff] }
  0x1a   :  { %160 = vmatpush.msra.mxu1 %v121_v7  ;;  %v182_v36 = vld [vmem:[%s1182_s6] sm:$0xff]  ;;  %v555_v47 = vld [vmem:[#allocation6 + $0x8] sm:$0xff]  ;;  %v1059_v59 = vld [vmem:[%s1178_s2 + $0x18] sm:$0xff] }
  0x1b   :  { %209 = vmatpush.msra.mxu2 %v188_v31  ;;  %232 = vmatpush.msra.mxu3 %v184_v32  ;;  %v696_v39 = vld [vmem:[%s1181_s5] ss:$0 sm:$0xff]  ;;  %v1064_v60 = vld [vmem:[%s1178_s2 + $0x8] sm:$0xff]  ;;  %v1090_v20 = vld [vmem:[%s1178_s2 + $0x30] sm:$0xff]  ;;  %s646_s5 = sshll.u32 %s857_s10, 4  ;;  %s647_s5 = int_to_ptr.vmem [resolvable:$true] %s646_s5 }
  0x1c   :  { %161 = vmatpush.msra.mxu1 %v120_v10  ;;  %v554_v48 = vld [vmem:[#allocation6] sm:$0xff]  ;;  %v1080_v10 = vld [vmem:[%s1178_s2 + $0x10] sm:$0xff]  ;;  %v1095_v21 = vld [vmem:[%s1178_s2 + $0x28] sm:$0xff] }
  0x1d   :  { %210 = vmatpush.msra.mxu2 %v187_v33  ;;  %233 = vmatpush.msra.mxu3 %v183_v34  ;;  %v697_v50 = vld [vmem:[%s1184_s8] ss:$0 sm:$0xff]  ;;  %v1104_v29 = vld [vmem:[%s1178_s2 + $0x38] sm:$0xff] }
  0x1e   :  { %162 = vmatpush.msra.mxu1 %v119_v11  ;;  %v131_v23 = vld [vmem:[#allocation2] sm:$0xff] }
  0x1f   :  { %678 = vmatmul.msk.f32.vlgmr.msra.gmra.mxu0 %vm98_vm0, %v131_v23  ;;  %211 = vmatpush.msra.mxu2 %v186_v35  ;;  %v192_v37 = vld [vmem:[#allocation2 + $0x8] sm:$0xff]  ;;  %v1052_v55 = vld [vmem:[%s1178_s2] sm:$0xff] }
  0x20   :  { %163 = vmatpush.msra.mxu1 %v118_v12  ;;  %234 = vmatpush.msra.mxu3 %v182_v36  ;;  %v1075_v9 = vld [vmem:[%s1178_s2 + $0x20] sm:$0xff]  ;;  %s856_s2 = smov [#allocation10]  }
  0x21   :  { %680 = vmatmul.msk.f32.vlgmr.msra.gmra.mxu2 %vm98_vm0, %v192_v37  ;;  %s656_s19 = sshll.u32 %s856_s2, 4  ;;  %s657_s19 = int_to_ptr.vmem [resolvable:$true] %s656_s19 }
  0x22   :  { %164 = vmatpush.msra.mxu1 %v117_v13  ;;  %620 = vmatpush.msrb.mxu2 %v557_v45 }
  0x24   :  { %165 = vmatpush.msra.mxu1 %v116_v14  ;;  %621 = vmatpush.msrb.mxu2 %v556_v46 }
  0x26   :  { %166 = vmatpush.msra.mxu1 %v115_v15  ;;  %622 = vmatpush.msrb.mxu2 %v555_v47 }
  0x28   :  { %167 = vmatpush.msra.mxu1 %v114_v16  ;;  %623 = vmatpush.msrb.mxu2 %v554_v48 }
  0x2a   :  { %168 = vmatpush.msra.mxu1 %v113_v17 }
  0x2c   :  { %169 = vmatpush.msra.mxu1 %v112_v18 }
  0x2e   :  { %170 = vmatpush.msra.mxu1 %v111_v19 }
  0x30   :  { %171 = vmatpush.msra.mxu1 %v110_v22 }
  0x83   :  { %v106_v26 = vpop.permute.xlu0 %105 }
  0x84   :  { %vm107_vm1 = vcmp.eq.s32.totalorder %v1011_v25, %v106_v26 }
  0x85   :  { %679 = vmatmul.msk.f32.vlgmr.msra.gmra.mxu1 %vm107_vm1, %v855_v27 }
  0x9c   :  { %v153_v38 = vpop.f32.mrf.mxu0 }
  0xa4   :  { %v213_v49 = vpop.f32.mrf.mxu2 }
 0x102   :  { %v173_v40 = vpop.f32.mrf.mxu1 }
 0x103   :  { %v174_v41 = vadd.f32 %v173_v40, %v153_v38 }
 0x105   :  { %v179_v42 = vadd.f32 %v696_v39, %v174_v41 }
 0x107   :  { %699 = vtanh.f32 %v179_v42 }
 0x10d   :  { %v700_v43 = vpop.eup %699 }
 0x10e   :  { %181 = vst.msk [vmem:[#allocation2] sm:$0xff] %vm98_vm0, %v700_v43  ;;  %681 = vmatmul.msk.f32.vlgmr.msra.gmra.mxu3 %vm98_vm0, %v700_v43 }
 0x115   :  { %v637_v44 = vld [vmem:[#allocation2] sm:$0xff] }
 0x116   :  { %639 = vst.msk [vmem:[#allocation10] sm:$0xff] %vm98_vm0, %v637_v44 }
 0x191   :  { %v236_v51 = vpop.f32.mrf.mxu3 }
 0x192   :  { %v237_v52 = vadd.f32 %v236_v51, %v213_v49 }
 0x194   :  { %v242_v53 = vadd.f32 %v697_v50, %v237_v52 }
 0x196   :  { %701 = vtanh.f32 %v242_v53 }
 0x19c   :  { %v702_v54 = vpop.eup %701 }
 0x19d   :  { %244 = vst.msk [vmem:[#allocation2 + $0x8] sm:$0xff] %vm98_vm0, %v702_v54  ;;  %683 = vmatmul.msk.f32.vlgmr.msrb.gmra.mxu2 %vm98_vm0, %v702_v54  ;;  %v261_v56 = vperm.slane %v702_v54, 0  ;;  %v256_v57 = vrot.slane %v702_v54, 3  ;;  %v254_v58 = vrot.slane %v702_v54, 1  ;;  %v257_v61 = vrot.slane %v702_v54, 4 }
 0x19e   :  { %v255_v1 = vrot.slane %v702_v54, 2  ;;  %v259_v14 = vrot.slane %v702_v54, 6  ;;  %v258_v15 = vrot.slane %v702_v54, 5  ;;  %v260_v24 = vrot.slane %v702_v54, 7 }
 0x19f   :  { %v277_v62 = vmul.f32 %v261_v56, %v1052_v55  ;;  %v264_v63 = vperm.slane %v256_v57, 0  ;;  %v262_v0 = vperm.slane %v254_v58, 0  ;;  %v265_v7 = vperm.slane %v257_v61, 0 }
 0x1a0   :  { %v263_v8 = vperm.slane %v255_v1, 0  ;;  %v267_v18 = vperm.slane %v259_v14, 0  ;;  %v266_v19 = vperm.slane %v258_v15, 0  ;;  %v268_v28 = vperm.slane %v260_v24, 0 }
 0x1a1   :  { %v285_v2 = vsel %vm98_vm0, %v277_v62, 0.0  ;;  %v280_v3 = vmul.f32 %v264_v63, %v1059_v59  ;;  %v278_v4 = vmul.f32 %v262_v0, %v1064_v60  ;;  %v281_v12 = vmul.f32 %v265_v7, %v1075_v9 }
 0x1a2   :  { %286 = vadd.xlane.f32.xlu0 %v285_v2  ;;  %v279_v13 = vmul.f32 %v263_v8, %v1080_v10  ;;  %v283_v22 = vmul.f32 %v267_v18, %v1090_v20  ;;  %v282_v23 = vmul.f32 %v266_v19, %v1095_v21  ;;  %v284_v30 = vmul.f32 %v268_v28, %v1104_v29 }
 0x1a3   :  { %v294_v5 = vsel %vm98_vm0, %v280_v3, 0.0  ;;  %v288_v6 = vsel %vm98_vm0, %v278_v4, 0.0  ;;  %v297_v16 = vsel %vm98_vm0, %v281_v12, 0.0 }
 0x1a4   :  { %295 = vadd.xlane.f32.xlu2 %v294_v5  ;;  %289 = vadd.xlane.f32.xlu1 %v288_v6  ;;  %v638_v11 = vld [vmem:[#allocation2 + $0x8] sm:$0xff]  ;;  %v291_v17 = vsel %vm98_vm0, %v279_v13, 0.0  ;;  %v303_v26 = vsel %vm98_vm0, %v283_v22, 0.0  ;;  %v300_v27 = vsel %vm98_vm0, %v282_v23, 0.0  ;;  %v306_v31 = vsel %vm98_vm0, %v284_v30, 0.0 }
 0x1a5   :  { %640 = vst.msk [vmem:[#allocation10 + $0x8] sm:$0xff] %vm98_vm0, %v638_v11 }
 0x1a6   :  { %664 = dma.vmem_to_hbm [thread:$0]  %s657_s19, 256, %s659_s9, [#allocation11], %s850_s16, %s850_s16, %s851_s17  }
 0x1ac   :  { %298 = vadd.xlane.f32.xlu2 %v297_v16  ;;  %292 = vadd.xlane.f32.xlu1 %v291_v17 }
 0x1b4   :  { %304 = vadd.xlane.f32.xlu2 %v303_v26  ;;  %301 = vadd.xlane.f32.xlu1 %v300_v27 }
 0x1bc   :  { %307 = vadd.xlane.f32.xlu1 %v306_v31 }
 0x215   :  { %v287_v34 = vpop.xlane.xlu0 %286 }
 0x216   :  { %v309_v39 = vmul.f32 0.17677669, %v287_v34 }
 0x217   :  { %v296_v32 = vpop.xlane.xlu2 %295  ;;  %v290_v33 = vpop.xlane.xlu1 %289 }
 0x218   :  { %v310_v37 = vmul.f32 0.17677669, %v290_v33  ;;  %v325_v42 = vperm.slane %v309_v39, %v1011_v25  ;;  %v312_v43 = vmul.f32 0.17677669, %v296_v32 }
 0x21a   :  { %v326_v40 = vperm.slane %v310_v37, %v1011_v25  ;;  %v328_v50 = vperm.slane %v312_v43, %v1011_v25 }
 0x21c   :  { %v334_v45 = vsel %vm333_vm2, %v326_v40, %v325_v42 }
 0x21f   :  { %v299_v35 = vpop.xlane.xlu2 %298  ;;  %v293_v36 = vpop.xlane.xlu1 %292 }
 0x220   :  { %v311_v38 = vmul.f32 0.17677669, %v293_v36  ;;  %v313_v48 = vmul.f32 0.17677669, %v299_v35 }
 0x222   :  { %v327_v41 = vperm.slane %v311_v38, %v1011_v25  ;;  %v329_v54 = vperm.slane %v313_v48, %v1011_v25 }
 0x224   :  { %v336_v49 = vsel %vm335_vm3, %v327_v41, %v334_v45 }
 0x225   :  { %v338_v52 = vsel %vm337_vm4, %v328_v50, %v336_v49 }
 0x226   :  { %v340_v58 = vsel %vm339_vm5, %v329_v54, %v338_v52 }
 0x227   :  { %v302_v44 = vpop.xlane.xlu1 %301  ;;  %v305_v46 = vpop.xlane.xlu2 %304 }
 0x228   :  { %v314_v47 = vmul.f32 0.17677669, %v302_v44  ;;  %v315_v51 = vmul.f32 0.17677669, %v305_v46 }
 0x22a   :  { %v330_v53 = vperm.slane %v314_v47, %v1011_v25  ;;  %v331_v56 = vperm.slane %v315_v51, %v1011_v25 }
 0x22c   :  { %v342_v62 = vsel %vm341_vm6, %v330_v53, %v340_v58 }
 0x22d   :  { %v344_v0 = vsel %vm343_vm7, %v331_v56, %v342_v62 }
 0x22f   :  { %v308_v57 = vpop.xlane.xlu1 %307 }
 0x230   :  { %v316_v61 = vmul.f32 0.17677669, %v308_v57 }
 0x232   :  { %v332_v63 = vperm.slane %v316_v61, %v1011_v25 }
 0x234   :  { %v346_v1 = vsel %vm345_vm8, %v332_v63, %v344_v0 }
 0x235   :  { %v349_v2 = vsel %vm348_vm9, %v346_v1, -inf }
 0x236   :  { %350 = vmax.xlane.f32.xlu2 %v349_v2 }
 0x2a9   :  { %v351_v3 = vpop.xlane.xlu2 %350 }
 0x2aa   :  { %v355_v4 = vperm.slane %v351_v3, 2  ;;  %v354_v5 = vperm.slane %v351_v3, 1  ;;  %v353_v6 = vperm.slane %v351_v3, 0  ;;  %v360_v12 = vperm.slane %v351_v3, 7 }
 0x2ab   :  { %v356_v13 = vperm.slane %v351_v3, 3  ;;  %v357_v14 = vperm.slane %v351_v3, 4  ;;  %v358_v26 = vperm.slane %v351_v3, 5  ;;  %v359_v30 = vperm.slane %v351_v3, 6 }
 0x2ac   :  { %v371_v7 = vsub.f32 %v311_v38, %v355_v4  ;;  %v370_v8 = vsub.f32 %v310_v37, %v354_v5  ;;  %v369_v11 = vsub.f32 %v309_v39, %v353_v6  ;;  %v376_v18 = vsub.f32 %v316_v61, %v360_v12  ;;  %v561_v5 = vld [vmem:[#allocation8 + $0x18] sm:$0xff]  ;;  %v560_v6 = vld [vmem:[#allocation8 + $0x10] sm:$0xff]  ;;  %v558_v12 = vld [vmem:[#allocation8] sm:$0xff] }
 0x2ad   :  { %v372_v19 = vsub.f32 %v312_v43, %v356_v13  ;;  %v373_v22 = vsub.f32 %v313_v48, %v357_v14  ;;  %v374_v33 = vsub.f32 %v314_v47, %v358_v26  ;;  %v375_v34 = vsub.f32 %v315_v51, %v359_v30  ;;  %598 = vmatpush.msrb.mxu0 %v561_v5 }
 0x2ae   :  { %v381_v15 = vmul.f32 1.442695, %v371_v7  ;;  %v379_v16 = vmul.f32 1.442695, %v370_v8  ;;  %v377_v17 = vmul.f32 1.442695, %v369_v11 }
 0x2af   :  { %v391_v23 = vmul.f32 1.442695, %v376_v18  ;;  %v383_v24 = vmul.f32 1.442695, %v372_v19  ;;  %v385_v28 = vmul.f32 1.442695, %v373_v22  ;;  %599 = vmatpush.msrb.mxu0 %v560_v6 }
 0x2b0   :  { %703 = vpow2.f32 %v381_v15  ;;  %v387_v35 = vmul.f32 1.442695, %v374_v33  ;;  %v389_v37 = vmul.f32 1.442695, %v375_v34  ;;  %v559_v8 = vld [vmem:[#allocation8 + $0x8] sm:$0xff] }
 0x2b1   :  { %705 = vpow2.f32 %v379_v16  ;;  %600 = vmatpush.msrb.mxu0 %v559_v8 }
 0x2b2   :  { %707 = vpow2.f32 %v377_v17 }
 0x2b3   :  { %709 = vpow2.f32 %v391_v23  ;;  %601 = vmatpush.msrb.mxu0 %v558_v12 }
 0x2b4   :  { %711 = vpow2.f32 %v383_v24 }
 0x2b5   :  { %713 = vpow2.f32 %v385_v28 }
 0x2b6   :  { %v704_v27 = vpop.eup %703  ;;  %715 = vpow2.f32 %v387_v35 }
 0x2b7   :  { %v706_v31 = vpop.eup %705  ;;  %408 = vperm.xlu0 %693, %v704_v27   ;;  %717 = vpow2.f32 %v389_v37 }
 0x2b8   :  { %v708_v32 = vpop.eup %707  ;;  %405 = vperm.xlu2 %695, %v706_v31  }
 0x2b9   :  { %402 = vperm.xlu1 %694, %v708_v32   ;;  %v710_v36 = vpop.eup %709 }
 0x2ba   :  { %v712_v38 = vpop.eup %711 }
 0x2bb   :  { %v714_v39 = vpop.eup %713 }
 0x2bc   :  { %v716_v40 = vpop.eup %715 }
 0x2bd   :  { %v718_v41 = vpop.eup %717 }
 0x2bf   :  { %423 = vperm.xlu0 %693, %v710_v36  }
 0x2c0   :  { %411 = vperm.xlu2 %695, %v712_v38  }
 0x2c1   :  { %414 = vperm.xlu1 %694, %v714_v39  }
 0x2c8   :  { %417 = vperm.xlu2 %695, %v716_v40  }
 0x2c9   :  { %420 = vperm.xlu1 %694, %v718_v41  }
 0x312   :  { %v406_v42 = vpop.permute.xlu2 %405 }
 0x313   :  { %v426_v47 = vperm.slane %v406_v42, %v1011_v25  ;;  %v453_v7 = vmul.f32 %v406_v42, %v1064_v60 }
 0x315   :  { %v467_v14 = vsel %vm98_vm0, %v453_v7, 0.0 }
 0x316   :  { %v468_v18 = vrot.slane %v467_v14, 4 }
 0x31a   :  { %v412_v44 = vpop.permute.xlu2 %411 }
 0x31b   :  { %v428_v53 = vperm.slane %v412_v44, %v1011_v25  ;;  %v455_v11 = vmul.f32 %v412_v44, %v1059_v59 }
 0x31d   :  { %v481_v15 = vsel %vm98_vm0, %v455_v11, 0.0 }
 0x322   :  { %v418_v54 = vpop.permute.xlu2 %417 }
 0x323   :  { %v430_v61 = vperm.slane %v418_v54, %v1011_v25 }
 0x329   :  { %v409_v45 = vpop.permute.xlu0 %408 }
 0x32a   :  { %v427_v48 = vperm.slane %v409_v45, %v1011_v25  ;;  %v454_v13 = vmul.f32 %v409_v45, %v1080_v10  ;;  %v482_v10 = vrot.slane %v481_v15, 4 }
 0x32b   :  { %v403_v43 = vpop.permute.xlu1 %402 }
 0x32c   :  { %v425_v46 = vperm.slane %v403_v43, %v1011_v25  ;;  %v452_v16 = vmul.f32 %v403_v43, %v1052_v55  ;;  %v474_v59 = vsel %vm98_vm0, %v454_v13, 0.0  ;;  %v469_v55 = vadd.f32 %v468_v18, %v467_v14 }
 0x32d   :  { %v475_v26 = vrot.slane %v474_v59, 4  ;;  %v483_v28 = vadd.f32 %v482_v10, %v481_v15 }
 0x32e   :  { %v433_v49 = vsel %vm333_vm2, %v426_v47, %v425_v46  ;;  %v460_v23 = vsel %vm98_vm0, %v452_v16, 0.0  ;;  %v470_v35 = vrot.slane %v469_v55, 2 }
 0x32f   :  { %v434_v51 = vsel %vm335_vm3, %v427_v48, %v433_v49  ;;  %v461_v30 = vrot.slane %v460_v23, 4  ;;  %v484_v36 = vrot.slane %v483_v28, 2 }
 0x330   :  { %v435_v56 = vsel %vm337_vm4, %v428_v53, %v434_v51  ;;  %v471_v43 = vadd.f32 %v470_v35, %v469_v55 }
 0x331   :  { %v424_v57 = vpop.permute.xlu0 %423  ;;  %v462_v37 = vadd.f32 %v461_v30, %v460_v23  ;;  %v485_v45 = vadd.f32 %v484_v36, %v483_v28 }
 0x332   :  { %v432_v0 = vperm.slane %v424_v57, %v1011_v25  ;;  %v472_v53 = vrot.slane %v471_v43, 1 }
 0x333   :  { %v415_v50 = vpop.permute.xlu1 %414  ;;  %v463_v46 = vrot.slane %v462_v37, 2 }
 0x334   :  { %v429_v52 = vperm.slane %v415_v50, %v1011_v25  ;;  %v456_v17 = vmul.f32 %v415_v50, %v1075_v9  ;;  %v473_v5 = vadd.f32 %v472_v53, %v471_v43 }
 0x336   :  { %v436_v58 = vsel %vm339_vm5, %v429_v52, %v435_v56  ;;  %v488_v24 = vsel %vm98_vm0, %v456_v17, 0.0  ;;  %v486_v56 = vrot.slane %v485_v45, 1 }
 0x337   :  { %v437_v1 = vsel %vm341_vm6, %v430_v61, %v436_v58  ;;  %v489_v31 = vrot.slane %v488_v24, 4 }
 0x338   :  { %v487_v11 = vadd.f32 %v486_v56, %v485_v45 }
 0x339   :  { %v490_v38 = vadd.f32 %v489_v31, %v488_v24 }
 0x33b   :  { %v421_v62 = vpop.permute.xlu1 %420  ;;  %v491_v47 = vrot.slane %v490_v38, 2 }
 0x33c   :  { %v431_v63 = vperm.slane %v421_v62, %v1011_v25  ;;  %v457_v25 = vmul.f32 %v418_v54, %v1095_v21  ;;  %v459_v21 = vmul.f32 %v424_v57, %v1104_v29  ;;  %v458_v19 = vmul.f32 %v421_v62, %v1090_v20 }
 0x33d   :  { %v476_v29 = vadd.f32 %v475_v26, %v474_v59  ;;  %v464_v57 = vadd.f32 %v463_v46, %v462_v37  ;;  %v492_v58 = vadd.f32 %v491_v47, %v490_v38  ;;  %v698_v46 = vld [vmem:[%s1187_s11] ss:$0 sm:$0xff]  ;;  %v625_v47 = vpop.f32.mrf.mxu2 }
 0x33e   :  { %v438_v2 = vsel %vm343_vm7, %v431_v63, %v437_v1  ;;  %v495_v60 = vsel %vm98_vm0, %v457_v25, 0.0  ;;  %v509_v9 = vsel %vm98_vm0, %v459_v21, 0.0  ;;  %v502_v27 = vsel %vm98_vm0, %v458_v19, 0.0 }
 0x33f   :  { %v439_v3 = vsel %vm345_vm8, %v432_v0, %v438_v2  ;;  %v496_v22 = vrot.slane %v495_v60, 4  ;;  %v510_v34 = vrot.slane %v509_v9, 4  ;;  %v503_v20 = vrot.slane %v502_v27, 4 }
 0x340   :  { %v441_v4 = vsel %vm348_vm9, %v439_v3, 0.0  ;;  %v477_v40 = vrot.slane %v476_v29, 2  ;;  %v465_v6 = vrot.slane %v464_v57, 1  ;;  %v493_v7 = vrot.slane %v492_v58, 1 }
 0x341   :  { %442 = vadd.xlane.f32.xlu2 %v441_v4  ;;  %v497_v32 = vadd.f32 %v496_v22, %v495_v60  ;;  %v511_v41 = vadd.f32 %v510_v34, %v509_v9  ;;  %v504_v42 = vadd.f32 %v503_v20, %v502_v27 }
 0x342   :  { %v478_v50 = vadd.f32 %v477_v40, %v476_v29  ;;  %v466_v21 = vadd.f32 %v465_v6, %v464_v57  ;;  %v494_v19 = vadd.f32 %v493_v7, %v492_v58 }
 0x343   :  { %v498_v39 = vrot.slane %v497_v32, 2  ;;  %v512_v51 = vrot.slane %v511_v41, 2  ;;  %v505_v52 = vrot.slane %v504_v42, 2 }
 0x344   :  { %v479_v1 = vrot.slane %v478_v50, 1 }
 0x345   :  { %v499_v48 = vadd.f32 %v498_v39, %v497_v32  ;;  %v513_v2 = vadd.f32 %v512_v51, %v511_v41  ;;  %v506_v3 = vadd.f32 %v505_v52, %v504_v42 }
 0x346   :  { %v480_v13 = vadd.f32 %v479_v1, %v478_v50 }
 0x347   :  { %v500_v62 = vrot.slane %v499_v48, 1  ;;  %v514_v14 = vrot.slane %v513_v2, 1  ;;  %v507_v15 = vrot.slane %v506_v3, 1 }
 0x349   :  { %v501_v25 = vadd.f32 %v500_v62, %v499_v48  ;;  %v515_v9 = vadd.f32 %v514_v14, %v513_v2  ;;  %v508_v27 = vadd.f32 %v507_v15, %v506_v3 }
 0x3b4   :  { %v443_v33 = vpop.xlane.xlu2 %442 }
 0x3b5   :  { %719 = vrcp.f32 %v443_v33  ;;  %v527_v61 = vand.u32 2147483648, %v443_v33  ;;  %v525_v0 = vand.u32 2147483647, %v443_v33  ;;  %vm521_vm11 = vweird.f32 %v443_v33 }
 0x3b7   :  { %v528_v8 = vor.u32 1.1754944e-38, %v527_v61  ;;  %vm526_vm13 = vcmp.eq.f32.partialorder %v525_v0, 8.507059e+37 }
 0x3bb   :  { %v720_v44 = vpop.eup %719 }
 0x3bc   :  { %v517_v49 = vmul.f32 %v720_v44, %v443_v33  ;;  %vm522_vm10 = vweird.f32 %v720_v44 }
 0x3bd   :  { %vm523_vm12 = vmor %vm521_vm11, %vm522_vm10 }
 0x3be   :  { %v518_v54 = vsub.f32 1.0, %v517_v49 }
 0x3c0   :  { %v519_v63 = vmul.f32 %v720_v44, %v518_v54 }
 0x3c2   :  { %v520_v4 = vadd.f32 %v720_v44, %v519_v63 }
 0x3c4   :  { %v524_v12 = vsel %vm523_vm12, %v720_v44, %v520_v4 }
 0x3c5   :  { %v529_v16 = vsel %vm526_vm13, %v528_v8, %v524_v12 }
 0x3c6   :  { %v531_v17 = vrot.slane %v529_v16, 1  ;;  %v532_v60 = vrot.slane %v529_v16, 2  ;;  %v533_v18 = vrot.slane %v529_v16, 3  ;;  %v534_v59 = vrot.slane %v529_v16, 4 }
 0x3c7   :  { %v535_v10 = vrot.slane %v529_v16, 5  ;;  %v536_v22 = vrot.slane %v529_v16, 6  ;;  %v537_v23 = vrot.slane %v529_v16, 7  ;;  %v546_v30 = vmul.f32 %v529_v16, %v466_v21 }
 0x3c8   :  { %v547_v24 = vmul.f32 %v531_v17, %v473_v5  ;;  %v548_v26 = vmul.f32 %v532_v60, %v480_v13  ;;  %v549_v55 = vmul.f32 %v533_v18, %v487_v11  ;;  %v550_v28 = vmul.f32 %v534_v59, %v494_v19 }
 0x3c9   :  { %v551_v31 = vmul.f32 %v535_v10, %v501_v25  ;;  %v552_v29 = vmul.f32 %v536_v22, %v508_v27  ;;  %v553_v34 = vmul.f32 %v537_v23, %v515_v9 }
 0x3ca   :  { %v570_v32 = vrot.slane %v547_v24, 7  ;;  %v572_v33 = vrot.slane %v548_v26, 6  ;;  %v574_v35 = vrot.slane %v549_v55, 5  ;;  %v576_v37 = vrot.slane %v550_v28, 4 }
 0x3cb   :  { %v578_v39 = vrot.slane %v551_v31, 3  ;;  %v580_v41 = vrot.slane %v552_v29, 2  ;;  %v582_v43 = vrot.slane %v553_v34, 1 }
 0x3cc   :  { %v571_v20 = vsel %vm333_vm2, %v570_v32, %v546_v30 }
 0x3cd   :  { %v573_v36 = vsel %vm335_vm3, %v572_v33, %v571_v20 }
 0x3ce   :  { %v575_v38 = vsel %vm337_vm4, %v574_v35, %v573_v36 }
 0x3cf   :  { %v577_v40 = vsel %vm339_vm5, %v576_v37, %v575_v38 }
 0x3d0   :  { %v579_v42 = vsel %vm341_vm6, %v578_v39, %v577_v40 }
 0x3d1   :  { %v581_v44 = vsel %vm343_vm7, %v580_v41, %v579_v42 }
 0x3d2   :  { %v583_v45 = vsel %vm345_vm8, %v582_v43, %v581_v44 }
 0x3d3   :  { %682 = vmatmul.msk.f32.vlgmr.msrb.gmra.mxu0 %vm98_vm0, %v583_v45 }
 0x450   :  { %v603_v48 = vpop.f32.mrf.mxu0 }
 0x451   :  { %v626_v49 = vadd.f32 %v625_v47, %v603_v48 }
 0x453   :  { %v632_v50 = vadd.f32 %v698_v46, %v626_v49 }
 0x455   :  { %633 = vst [vmem:[#allocation9] sm:$0xff] %v632_v50 }
 0x456   :  { %651 = dma.vmem_to_hbm [thread:$0]  %s647_s5, 128, %s649_s23, [#allocation5]  }
 0x457   :  { %845 = dma.done.wait [#allocation5], 128  }
 0x458   :  { %846 = vsyncadd [#allocation5], 4294967168 }
 0x459   :  { %847 = dma.done.wait [#allocation11], 256  }
 0x45a   :  { %848 = vsyncadd [#allocation11], 4294967040 }
 0x45b   :  { %673 = vsyncpa [#allocation4], 1 }
 0x45c   :  { %674 = vsyncpa [#allocation7], 1 }
 0x45d   :  { %675 = vsyncpa [#allocation5], 1 }
 0x45e   :  { %676 = vsyncpa [#allocation11], 1 }

</bundles_post_ra>
